<compile_context>
chip_gen: v6e
topology: v6e:2x2x1
jax: 0.10.0
libtpu: 0.0.40
codegen_flags: <defaults>
</compile_context>

<pallas_src>
import functools

import jax
import jax.numpy as jnp
from jax.experimental import pallas as pl
from jax.experimental.pallas import tpu as pltpu


def _round_down(a: int, m: int) -> int:
    return (a // m) * m


def _round_up(a: int, m: int) -> int:
    return ((a + m - 1) // m) * m


def _sobel_kernel(x_ref, o_ref, *, H, W, eps_adj, scale, rc):
    """Block: (TN, H*W). Each lane-row is one flattened image."""
    HW = H * W
    tn = x_ref.shape[0]
    n_chunks = tn // rc

    # Loop-invariant edge-clamp masks, built once per grid step at full (rc, HW)
    # shape (hoisted out of the chunk loop: JAX does not CSE broadcasts).
    lane = jax.lax.broadcasted_iota(jnp.int32, (rc, HW), 1)      # k = flat index
    if (W & (W - 1)) == 0:
        col = jnp.bitwise_and(lane, W - 1)                       # j = k % W
    else:
        col = lane - W * (lane // W)
    first_col = col == 0
    last_col = col == W - 1
    first_row = lane < W
    last_row = lane >= HW - W

    # Circular-roll amounts (positive, < HW).  roll(x, s)[k] == x[(k - s) % HW].
    s_up = W % HW            # x[k - W]  (row above)
    s_down = (HW - W) % HW   # x[k + W]  (row below)
    s_left = 1 % HW          # v[k - 1]
    s_right = (HW - 1) % HW  # v[k + 1]

    def process(r0):
        x = x_ref[pl.ds(r0, rc), :].astype(jnp.float32)          # (rc, HW)

        # ---- H direction: replicate-clamped +-W neighbours via XLU lane rolls.
        up = jnp.where(first_row, x, pltpu.roll(x, s_up, 1))
        down = jnp.where(last_row, x, pltpu.roll(x, s_down, 1))
        sy = up + 2.0 * x + down        # [1, 2, 1]^T smoothing along H
        dy = down - up                  # [-1, 0, 1]^T derivative along H

        # ---- W direction: replicate-clamped +-1 neighbours via XLU lane rolls.
        l_sy = jnp.where(first_col, sy, pltpu.roll(sy, s_left, 1))
        r_sy = jnp.where(last_col, sy, pltpu.roll(sy, s_right, 1))
        gx0 = r_sy - l_sy               # [-1, 0, 1] along W (unscaled)

        l_dy = jnp.where(first_col, dy, pltpu.roll(dy, s_left, 1))
        r_dy = jnp.where(last_col, dy, pltpu.roll(dy, s_right, 1))
        gy0 = l_dy + 2.0 * dy + r_dy    # [1, 2, 1] along W (unscaled)

        # Single post-sqrt scale; eps_adj = eps / scale^2 (trace-time constant).
        mag = scale * jnp.sqrt(gx0 * gx0 + gy0 * gy0 + eps_adj)
        o_ref[pl.ds(r0, rc), :] = mag.astype(o_ref.dtype)

    if n_chunks == 1:
        process(0)
    else:
        def body(c, carry):
            process(pl.multiple_of(c * rc, rc))
            return carry
        jax.lax.fori_loop(0, n_chunks, body, None,
                          unroll=True if n_chunks <= 4 else 2)


def sobel_pallas(x: jax.Array, normalized: bool = True, eps: float = 1e-6,
                 block_rows: int | None = None) -> jax.Array:
    """Sobel edge magnitude. x: [B, C, H, W] -> [B, C, H, W]."""
    assert x.ndim == 4, "expected [B, C, H, W]"
    B, C, H, W = x.shape
    N, HW = B * C, H * W
    scale = (1.0 / 8.0) if normalized else 1.0      # L1 norm of each 3x3 kernel = 8
    eps_adj = float(eps) / (scale * scale)

    xf = x.reshape(N, HW)                           # free reshape: one image per row

    # Rows (images) per inner chunk.  rc=16 for small images keeps the chunk loop
    # short without exceeding the ~10-live-temp vreg budget (each temp is
    # rc/8 * HW/128 vregs).
    rc = 16 if (HW <= 512 and N >= 32) else min(8, N)

    # Rows per grid step: ~4 MiB of input (amortizes the ~0.35 us per-step
    # overhead), but capped so the grid has >= 2 steps whenever N allows
    # (megacore sharding of the "parallel" axis on v7x).
    if block_rows is not None:
        TN = max(rc, _round_down(min(int(block_rows), N), rc))
    elif N <= rc:
        TN = N
    else:
        itemsize = x.dtype.itemsize
        rows_target = max(rc, _round_down((4 << 20) // (HW * itemsize), rc))
        half = max(rc, _round_up(pl.cdiv(N, 2), rc))
        TN = max(rc, min(rows_target, half, _round_down(N, rc)))
    # TODO(synk): for a single enormous image (H*W*4 bytes approaching VMEM /
    # the vreg budget) add lane-dim (H) tiling with a 1-row halo; not needed here.

    grid = (pl.cdiv(N, TN),)

    # Explicit scoped-VMEM limit: double-buffered in + out blocks plus headroom
    # (needed on v5e's 16 MiB default once blocks exceed ~1 MiB of input).
    block_bytes = TN * HW * x.dtype.itemsize
    vmem_limit = int(min(max(6 * block_bytes, 32 << 20), 56 << 20))

    kernel = functools.partial(
        _sobel_kernel, H=H, W=W, eps_adj=eps_adj, scale=float(scale), rc=rc)

    out = pl.pallas_call(
        kernel,
        out_shape=jax.ShapeDtypeStruct((N, HW), x.dtype),
        grid_spec=pltpu.PrefetchScalarGridSpec(
            num_scalar_prefetch=0,
            grid=grid,
            in_specs=[pl.BlockSpec((TN, HW), lambda n: (n, 0))],   # TN flat images
            out_specs=pl.BlockSpec((TN, HW), lambda n: (n, 0)),
        ),
        compiler_params=pltpu.CompilerParams(
            dimension_semantics=("parallel",),
            vmem_limit_bytes=vmem_limit,
        ),
    )(xf)

    return out.reshape(B, C, H, W)


def sobel_reference(x: jax.Array, normalized: bool = True, eps: float = 1e-6) -> jax.Array:
    """Pure-JAX reference (mirrors the torch module) for validation."""
    B, C, H, W = x.shape
    scale = (1.0 / 8.0) if normalized else 1.0
    kx = jnp.array([[-1.0, 0.0, 1.0],
                    [-2.0, 0.0, 2.0],
                    [-1.0, 0.0, 1.0]], dtype=jnp.float32) * scale
    ky = jnp.array([[-1.0, -2.0, -1.0],
                    [0.0, 0.0, 0.0],
                    [1.0, 2.0, 1.0]], dtype=jnp.float32) * scale
    xp = jnp.pad(x.reshape(B * C, H, W), ((0, 0), (1, 1), (1, 1)), mode="edge")
    gx = jnp.zeros((B * C, H, W), jnp.float32)
    gy = jnp.zeros((B * C, H, W), jnp.float32)
    for di in range(3):
        for dj in range(3):
            w = xp[:, di:di + H, dj:dj + W].astype(jnp.float32)
            gx = gx + kx[di, dj] * w
            gy = gy + ky[di, dj] * w
    mag = jnp.sqrt(gx * gx + gy * gy + eps).astype(x.dtype)
    return mag.reshape(B, C, H, W)


if __name__ == "__main__":
    key = jax.random.PRNGKey(0)

    # Shape implied by the module's forward: [B, C, H, W]
    B, C, H, W = 2, 4, 16, 16
    x = jax.random.uniform(key, (B, C, H, W), dtype=jnp.float32)

    out = jax.block_until_ready(sobel_pallas(x, normalized=True, eps=1e-6))
    ref = sobel_reference(x, normalized=True, eps=1e-6)
    assert out.shape == (B, C, H, W)
    assert jnp.allclose(out, ref, atol=1e-5, rtol=1e-5)

    # Multiple grid steps (megacore split path) with default block sizing.
    x2 = jax.random.uniform(jax.random.PRNGKey(1), (4, 8, 16, 16), dtype=jnp.float32)
    out2 = jax.block_until_ready(sobel_pallas(x2))
    assert jnp.allclose(out2, sobel_reference(x2), atol=1e-5, rtol=1e-5)

    # Multiple grid steps + multi-chunk fori_loop inside each block.
    x3 = jax.random.uniform(jax.random.PRNGKey(2), (8, 8, 16, 16), dtype=jnp.float32)
    out3 = jax.block_until_ready(sobel_pallas(x3, block_rows=32))
    assert jnp.allclose(out3, sobel_reference(x3), atol=1e-5, rtol=1e-5)

    # N not a multiple of the block: padded last grid block (outputs discarded).
    x4 = jax.random.uniform(jax.random.PRNGKey(3), (3, 3, 16, 16), dtype=jnp.float32)
    out4 = jax.block_until_ready(sobel_pallas(x4))
    assert jnp.allclose(out4, sobel_reference(x4), atol=1e-5, rtol=1e-5)

    print("KERNEL_OK")
</pallas_src>

<mosaic_0001>
module attributes {stable_mosaic.version = 11 : i64} {
  func.func @_sobel_kernel(%arg0: i32, %arg1: memref<8x256xf32, #tpu.memory_space<vmem>>, %arg2: memref<8x256xf32, #tpu.memory_space<vmem>>) attributes {dimension_semantics = [#tpu.dimension_semantics<parallel>], iteration_bounds = array<i64: 1>, scalar_prefetch = 0 : i64, scratch_operands = 0 : i64, tpu.core_type = #tpu.core_type<tc>, window_params = [{transform_indices = @transform_0, window_bounds = array<i64: 8, 256>}, {transform_indices = @transform_1, window_bounds = array<i64: 8, 256>}]} {
    %0 = tpu.iota {dimensions = array<i32: 1>} : vector<8x256xi32>
    %c15_i32 = arith.constant 15 : i32
    %1 = vector.broadcast %c15_i32 : i32 to vector<8x256xi32>
    %2 = arith.andi %0, %1 : vector<8x256xi32>
    %c0_i32 = arith.constant 0 : i32
    %3 = vector.broadcast %c0_i32 : i32 to vector<8x256xi32>
    %4 = arith.cmpi eq, %2, %3 : vector<8x256xi32>
    %c15_i32_0 = arith.constant 15 : i32
    %5 = vector.broadcast %c15_i32_0 : i32 to vector<8x256xi32>
    %6 = arith.cmpi eq, %2, %5 : vector<8x256xi32>
    %c16_i32 = arith.constant 16 : i32
    %7 = vector.broadcast %c16_i32 : i32 to vector<8x256xi32>
    %8 = arith.cmpi slt, %0, %7 : vector<8x256xi32>
    %c240_i32 = arith.constant 240 : i32
    %9 = vector.broadcast %c240_i32 : i32 to vector<8x256xi32>
    %10 = arith.cmpi sge, %0, %9 : vector<8x256xi32>
    %c0 = arith.constant 0 : index
    %c0_1 = arith.constant 0 : index
    %11 = vector.load %arg1[%c0, %c0_1] : memref<8x256xf32, #tpu.memory_space<vmem>>, vector<8x256xf32>
    %c16_i32_2 = arith.constant 16 : i32
    %12 = tpu.dynamic_rotate %11 by %c16_i32_2 dim 1 : vector<8x256xf32>, i32 -> vector<8x256xf32>
    %13 = arith.select %8, %11, %12 : vector<8x256xi1>, vector<8x256xf32>
    %c240_i32_3 = arith.constant 240 : i32
    %14 = tpu.dynamic_rotate %11 by %c240_i32_3 dim 1 : vector<8x256xf32>, i32 -> vector<8x256xf32>
    %15 = arith.select %10, %11, %14 : vector<8x256xi1>, vector<8x256xf32>
    %cst = arith.constant 2.000000e+00 : f32
    %16 = vector.broadcast %cst : f32 to vector<8x256xf32>
    %17 = arith.mulf %16, %11 : vector<8x256xf32>
    %18 = arith.addf %13, %17 : vector<8x256xf32>
    %19 = arith.addf %18, %15 : vector<8x256xf32>
    %20 = arith.subf %15, %13 : vector<8x256xf32>
    %c1_i32 = arith.constant 1 : i32
    %21 = tpu.dynamic_rotate %19 by %c1_i32 dim 1 : vector<8x256xf32>, i32 -> vector<8x256xf32>
    %22 = arith.select %4, %19, %21 : vector<8x256xi1>, vector<8x256xf32>
    %c255_i32 = arith.constant 255 : i32
    %23 = tpu.dynamic_rotate %19 by %c255_i32 dim 1 : vector<8x256xf32>, i32 -> vector<8x256xf32>
    %24 = arith.select %6, %19, %23 : vector<8x256xi1>, vector<8x256xf32>
    %25 = arith.subf %24, %22 : vector<8x256xf32>
    %c1_i32_4 = arith.constant 1 : i32
    %26 = tpu.dynamic_rotate %20 by %c1_i32_4 dim 1 : vector<8x256xf32>, i32 -> vector<8x256xf32>
    %27 = arith.select %4, %20, %26 : vector<8x256xi1>, vector<8x256xf32>
    %c255_i32_5 = arith.constant 255 : i32
    %28 = tpu.dynamic_rotate %20 by %c255_i32_5 dim 1 : vector<8x256xf32>, i32 -> vector<8x256xf32>
    %29 = arith.select %6, %20, %28 : vector<8x256xi1>, vector<8x256xf32>
    %cst_6 = arith.constant 2.000000e+00 : f32
    %30 = vector.broadcast %cst_6 : f32 to vector<8x256xf32>
    %31 = arith.mulf %30, %20 : vector<8x256xf32>
    %32 = arith.addf %27, %31 : vector<8x256xf32>
    %33 = arith.addf %32, %29 : vector<8x256xf32>
    %34 = arith.mulf %25, %25 : vector<8x256xf32>
    %35 = arith.mulf %33, %33 : vector<8x256xf32>
    %36 = arith.addf %34, %35 : vector<8x256xf32>
    %cst_7 = arith.constant 6.400000e-05 : f32
    %37 = vector.broadcast %cst_7 : f32 to vector<8x256xf32>
    %38 = arith.addf %36, %37 : vector<8x256xf32>
    %39 = math.sqrt %38 : vector<8x256xf32>
    %cst_8 = arith.constant 1.250000e-01 : f32
    %40 = vector.broadcast %cst_8 : f32 to vector<8x256xf32>
    %41 = arith.mulf %40, %39 : vector<8x256xf32>
    %c0_9 = arith.constant 0 : index
    %c0_10 = arith.constant 0 : index
    %42 = vector.load %arg2[%c0_9, %c0_10] : memref<8x256xf32, #tpu.memory_space<vmem>>, vector<8x256xf32>
    tpu.vector_store %arg2[%c0_9, %c0_10], %41 {strides = array<i32>} : memref<8x256xf32, #tpu.memory_space<vmem>>, vector<8x256xf32>,
    return
  }
  func.func @transform_0(%arg0: i32) -> (i32, i32) {
    %c0_i32 = arith.constant 0 : i32
    %c0_i32_0 = arith.constant 0 : i32
    return %arg0, %c0_i32 : i32, i32
  }
  func.func @transform_1(%arg0: i32) -> (i32, i32) {
    %c0_i32 = arith.constant 0 : i32
    %c0_i32_0 = arith.constant 0 : i32
    return %arg0, %c0_i32 : i32, i32
  }
}

</mosaic_0001>

<bundles_post_ra>
// kernel: tpu_custom_call.1
= control target key start
LH: loop header
LB: loop body
LE: loop exit
PB: predicated region body
PF: predicated region fallthrough
CT: control target
= control target key end

     0   :  { %6 = vsyncpa [#allocation3], 0  ;;  %s268_s0 = inlined_call_operand.hbm [shape: f32[8,256], index: 0, kind: input, shape index: {}]   ;;  %s269_s1 = inlined_call_operand.hbm [shape: f32[8,256], index: 1, kind: output, shape index: {}]  }
   0x1   :  { %7 = vsyncpa [#allocation4], 0  ;;  %s198_s6 = smov [#allocation2]  }
   0x2   :  { %s14_s7 = sshll.u32 %s198_s6, 4  ;;  %s15_s7 = int_to_ptr.vmem [resolvable:$true] %s14_s7 }
   0x3   :  { %s162_s8 = scalar_lea.vmem %s15_s7, 256  ;;  %p167_p1 = scmp.lt.s32.totalorder %s15_s7, %s15_s7 }
   0x4   :  { %p163_p0 = scmp.ne.s32.totalorder %s15_s7, %s162_s8  ;;  %p168_p2 = scmp.lt.s32.totalorder %s162_s8, %s162_s8 }
   0x6   :  { %p169_p3 = por %p168_p2, %p167_p1 }
   0x8   :  { %p170_p4 = pnand %p169_p3, %p163_p0 }
   0xa   :  { %173 = shalt.err (!%p170_p4)
}
   0xb   :  { %17 = dma.hbm_to_vmem [thread:$0]  %s268_s0, 256, %s15_s7, [#allocation3]  }
   0xc   :  { %194 = dma.done.wait [#allocation3], 256  }
   0xd   :  { %195 = vsyncadd [#allocation3], 4294967040  ;;  %v34_v0 = vld [vmem:[#allocation2] sm:$0xff]  ;;  %s199_s11 = smov 112   ;;  %s200_s12 = smov 16   ;;  %v35_v1 = vld [vmem:[#allocation2 + $0x8] sm:$0xff]  ;;  %v21_v2 = vlaneseq }
   0xe   :  { %44 = vrot.lane.b32.xlu1 %v34_v0, %s199_s11  ;;  %36 = vrot.lane.b32.xlu0 %v34_v0, %s200_s12  ;;  %v54_v7 = vmul.f32 2.0, %v35_v1  ;;  %v53_v8 = vmul.f32 2.0, %v34_v0  ;;  %s201_s0 = smov 1   ;;  %s202_s13 = smov 127  }
   0xf   :  { %v217_v3 = vand.u32 127, %v21_v2  ;;  %s203_s14 = smov [#allocation5]  }
  0x10   :  { %s135_s15 = sshll.u32 %s203_s14, 4  ;;  %s136_s15 = int_to_ptr.vmem [resolvable:$true] %s135_s15 }
  0x11   :  { %v23_v4 = vadd.s32 128, %v217_v3  ;;  %vm48_vm0 = vcmp.lt.s32.totalorder %v217_v3, 112  ;;  %vm30_vm1 = vcmp.lt.s32.totalorder %v217_v3, 16  ;;  %v24_v25 = vand.u32 15, %v217_v3  ;;  %s174_s16 = scalar_lea.vmem %s136_s15, 256  ;;  %p179_p6 = scmp.lt.s32.totalorder %s136_s15, %s136_s15 }
  0x12   :  { %46 = vrot.lane.b32.xlu1 %v35_v1, %s199_s11  ;;  %38 = vrot.lane.b32.xlu0 %v35_v1, %s200_s12  ;;  %vm65_vm3 = vcmp.lt.s32.totalorder %v217_v3, 1  ;;  %vm74_vm6 = vcmp.lt.s32.totalorder %v217_v3, 127  ;;  %p175_p5 = scmp.ne.s32.totalorder %s136_s15, %s174_s16  ;;  %p180_p7 = scmp.lt.s32.totalorder %s174_s16, %s174_s16 }
  0x13   :  { %vm33_vm2 = vcmp.ge.s32.totalorder %v23_v4, 240  ;;  %v25_v26 = vand.u32 15, %v23_v4  ;;  %vm224_vm4 = vcmp.eq.s32.totalorder %v24_v25, 0  ;;  %vm233_vm7 = vcmp.eq.s32.totalorder %v24_v25, 15 }
  0x14   :  { %p181_p8 = por %p180_p7, %p179_p6 }
  0x15   :  { %vm228_vm5 = vcmp.eq.s32.totalorder %v25_v26, 0  ;;  %vm237_vm8 = vcmp.eq.s32.totalorder %v25_v26, 15 }
  0x16   :  { %p182_p9 = pnand %p181_p8, %p175_p5 }
  0x80   :  { %v45_v5 = vpop.permute.xlu1 %44  ;;  %v37_v6 = vpop.permute.xlu0 %36 }
  0x84   :  { %v47_v9 = vpop.permute.xlu1 %46  ;;  %v39_v10 = vpop.permute.xlu0 %38 }
  0x85   :  { %v49_v11 = vsel %vm48_vm0, %v45_v5, %v47_v9  ;;  %v50_v12 = vsel %vm48_vm0, %v47_v9, %v45_v5  ;;  %v40_v13 = vsel %vm30_vm1, %v37_v6, %v39_v10  ;;  %v41_v14 = vsel %vm30_vm1, %v39_v10, %v37_v6 }
  0x86   :  { %v52_v15 = vsel %vm33_vm2, %v35_v1, %v50_v12  ;;  %v42_v16 = vsel %vm30_vm1, %v34_v0, %v41_v14  ;;  %v56_v18 = vadd.f32 %v54_v7, %v40_v13 }
  0x87   :  { %v55_v17 = vadd.f32 %v53_v8, %v42_v16  ;;  %v59_v19 = vsub.f32 %v49_v11, %v42_v16  ;;  %v60_v20 = vsub.f32 %v52_v15, %v40_v13 }
  0x88   :  { %v58_v22 = vadd.f32 %v56_v18, %v52_v15 }
  0x89   :  { %81 = vrot.lane.b32.xlu0 %v59_v19, %s201_s0  ;;  %83 = vrot.lane.b32.xlu1 %v60_v20, %s201_s0  ;;  %v57_v21 = vadd.f32 %v55_v17, %v49_v11  ;;  %v97_v43 = vmul.f32 2.0, %v59_v19  ;;  %v98_v44 = vmul.f32 2.0, %v60_v20 }
  0x8d   :  { %63 = vrot.lane.b32.xlu1 %v58_v22, %s201_s0  ;;  %61 = vrot.lane.b32.xlu0 %v57_v21, %s201_s0 }
  0x91   :  { %72 = vrot.lane.b32.xlu1 %v58_v22, %s202_s13  ;;  %70 = vrot.lane.b32.xlu0 %v57_v21, %s202_s13 }
  0x95   :  { %91 = vrot.lane.b32.xlu1 %v60_v20, %s202_s13  ;;  %89 = vrot.lane.b32.xlu0 %v59_v19, %s202_s13 }
  0xfb   :  { %v82_v23 = vpop.permute.xlu0 %81  ;;  %v84_v24 = vpop.permute.xlu1 %83 }
  0xfc   :  { %v85_v31 = vsel %vm65_vm3, %v82_v23, %v84_v24  ;;  %v86_v32 = vsel %vm65_vm3, %v84_v24, %v82_v23 }
  0xfd   :  { %v87_v35 = vsel %vm224_vm4, %v59_v19, %v86_v32  ;;  %v88_v36 = vsel %vm228_vm5, %v60_v20, %v85_v31 }
  0xfe   :  { %v99_v47 = vadd.f32 %v97_v43, %v87_v35  ;;  %v100_v48 = vadd.f32 %v98_v44, %v88_v36 }
  0xff   :  { %v64_v27 = vpop.permute.xlu1 %63  ;;  %v62_v28 = vpop.permute.xlu0 %61 }
 0x100   :  { %v66_v39 = vsel %vm65_vm3, %v62_v28, %v64_v27  ;;  %v67_v40 = vsel %vm65_vm3, %v64_v27, %v62_v28 }
 0x101   :  { %v68_v49 = vsel %vm224_vm4, %v57_v21, %v67_v40  ;;  %v69_v50 = vsel %vm228_vm5, %v58_v22, %v66_v39 }
 0x103   :  { %v73_v37 = vpop.permute.xlu1 %72  ;;  %v71_v38 = vpop.permute.xlu0 %70 }
 0x104   :  { %v75_v41 = vsel %vm74_vm6, %v71_v38, %v73_v37  ;;  %v76_v42 = vsel %vm74_vm6, %v73_v37, %v71_v38 }
 0x105   :  { %v77_v45 = vsel %vm233_vm7, %v57_v21, %v75_v41  ;;  %v78_v46 = vsel %vm237_vm8, %v58_v22, %v76_v42 }
 0x106   :  { %v79_v53 = vsub.f32 %v77_v45, %v68_v49  ;;  %v80_v54 = vsub.f32 %v78_v46, %v69_v50 }
 0x107   :  { %v92_v51 = vpop.permute.xlu1 %91  ;;  %v90_v52 = vpop.permute.xlu0 %89 }
 0x108   :  { %v93_v55 = vsel %vm74_vm6, %v90_v52, %v92_v51  ;;  %v94_v56 = vsel %vm74_vm6, %v92_v51, %v90_v52  ;;  %v103_v61 = vmul.f32 %v79_v53, %v79_v53  ;;  %v104_v62 = vmul.f32 %v80_v54, %v80_v54 }
 0x109   :  { %v95_v57 = vsel %vm233_vm7, %v59_v19, %v93_v55  ;;  %v96_v58 = vsel %vm237_vm8, %v60_v20, %v94_v56 }
 0x10a   :  { %v101_v59 = vadd.f32 %v99_v47, %v95_v57  ;;  %v102_v60 = vadd.f32 %v100_v48, %v96_v58 }
 0x10c   :  { %v105_v63 = vmul.f32 %v101_v59, %v101_v59  ;;  %v106_v0 = vmul.f32 %v102_v60, %v102_v60 }
 0x10e   :  { %v107_v1 = vadd.f32 %v105_v63, %v103_v61  ;;  %v108_v2 = vadd.f32 %v106_v0, %v104_v62 }
 0x110   :  { %v109_v4 = vadd.f32 6.4e-05, %v107_v1  ;;  %v110_v5 = vadd.f32 6.4e-05, %v108_v2 }
 0x112   :  { %150 = vrsqrt.f32 %v109_v4  ;;  %vm113_vm9 = vcmp.eq.f32.partialorder %v109_v4, inf  ;;  %v116_v8 = vand.u32 2147483648, %v109_v4  ;;  %vm115_vm10 = vcmp.eq.f32.partialorder %v109_v4, 0.0 }
 0x113   :  { %152 = vrsqrt.f32 %v110_v5  ;;  %vm120_vm11 = vcmp.eq.f32.partialorder %v110_v5, inf  ;;  %v123_v11 = vand.u32 2147483648, %v110_v5  ;;  %vm122_vm12 = vcmp.eq.f32.partialorder %v110_v5, 0.0 }
 0x11f   :  { %v151_v3 = vpop.eup %150 }
 0x120   :  { %v153_v6 = vpop.eup %152  ;;  %v112_v7 = vmul.f32 %v151_v3, %v109_v4 }
 0x121   :  { %v119_v9 = vmul.f32 %v153_v6, %v110_v5 }
 0x122   :  { %v114_v10 = vsel %vm113_vm9, %v109_v4, %v112_v7 }
 0x123   :  { %v117_v12 = vsel %vm115_vm10, %v116_v8, %v114_v10  ;;  %v121_v13 = vsel %vm120_vm11, %v110_v5, %v119_v9 }
 0x124   :  { %v124_v14 = vsel %vm122_vm12, %v123_v11, %v121_v13  ;;  %v125_v15 = vmul.f32 0.125, %v117_v12 }
 0x125   :  { %v126_v16 = vmul.f32 0.125, %v124_v14 }
 0x126   :  { %127 = vst [vmem:[#allocation5] sm:$0xff] %v125_v15 }
 0x127   :  { %128 = vst [vmem:[#allocation5 + $0x8] sm:$0xff] %v126_v16 }
 0x128   :  { %185 = shalt.err (!%p182_p9)
}
 0x129   :  { %138 = dma.vmem_to_hbm [thread:$0]  %s136_s15, 256, %s269_s1, [#allocation4]  }
 0x12a   :  { %196 = dma.done.wait [#allocation4], 256  }
 0x12b   :  { %197 = vsyncadd [#allocation4], 4294967040 }
 0x12c   :  { %142 = vsyncpa [#allocation3], 1 }
 0x12d   :  { %143 = vsyncpa [#allocation4], 1 }

</bundles_post_ra>
